<compile_context>
chip_gen: v7x
topology: tpu7x:2x2x1
jax: 0.10.0
libtpu: 0.0.40
codegen_flags: <defaults>
</compile_context>

<pallas_src>
import jax
import jax.numpy as jnp
from jax import lax
from jax.experimental import pallas as pl
from jax.experimental.pallas import tpu as pltpu


# -----------------------------------------------------------------------------
# JAX glue: exact 2x bilinear upsample (align_corners=False, half-pixel).
# For an integer 2x upscale, antialias=True has no effect, so this matches
# F.interpolate(x, scale_factor=2, mode='bilinear', antialias=True).
# -----------------------------------------------------------------------------
def upsample_2x_bilinear(x):
    def up_axis(v, axis):
        n = v.shape[axis]
        first = lax.slice_in_dim(v, 0, 1, axis=axis)
        last = lax.slice_in_dim(v, n - 1, n, axis=axis)
        prev = jnp.concatenate([first, lax.slice_in_dim(v, 0, n - 1, axis=axis)], axis=axis)
        nxt = jnp.concatenate([lax.slice_in_dim(v, 1, n, axis=axis), last], axis=axis)
        even = 0.25 * prev + 0.75 * v   # output index 2k
        odd = 0.75 * v + 0.25 * nxt     # output index 2k + 1
        st = jnp.stack([even, odd], axis=axis + 1)
        return st.reshape(v.shape[:axis] + (2 * n,) + v.shape[axis + 1:])
    return up_axis(up_axis(x, 2), 3)


# -----------------------------------------------------------------------------
# One-time, cached probe: rotation-direction convention of pltpu.roll on the
# current backend, so the conv tap shifts are always correct.
# -----------------------------------------------------------------------------
_ROLL_MATCHES_JNP = None


def _roll_matches_jnp_semantics():
    """True iff pltpu.roll(x, s, axis) behaves like jnp.roll(x, s, axis)."""
    global _ROLL_MATCHES_JNP
    if _ROLL_MATCHES_JNP is None:
        def probe(x_ref, o_ref):
            o_ref[...] = pltpu.roll(x_ref[...], 1, axis=1)

        x = jnp.broadcast_to(jnp.arange(128, dtype=jnp.float32), (8, 128))
        out = pl.pallas_call(
            probe, out_shape=jax.ShapeDtypeStruct((8, 128), jnp.float32))(x)
        # jnp.roll semantics => out[:, 1] == x[:, 0] == 0.
        _ROLL_MATCHES_JNP = bool(abs(float(jax.device_get(out)[0, 1])) < 0.5)
    return _ROLL_MATCHES_JNP


# -----------------------------------------------------------------------------
# Pallas kernel
# -----------------------------------------------------------------------------
def _make_synthesis_kernel(H, W, is_first_block, apply_noise, md, roll_like_jnp):
    N = H * W
    # tap k = (dh+1)*3 + (dw+1); flat lane shift s = dh*W + dw
    shifts = [dh * W + dw for dh in (-1, 0, 1) for dw in (-1, 0, 1)]

    def lane_shift(v, s):
        # Want out[:, p] = v[:, (p + s) mod N]; wrapped lanes are masked after.
        if s == 0:
            return v
        amt = ((-s) if roll_like_jnp else s) % N
        return pltpu.roll(v, amt, axis=1)

    def conv3x3(v, w_ref, b_ref, mask_ref):
        # v: (Cin, N).  Single cast to the MXU operand dtype BEFORE the rolls
        # (bf16 rolls halve XLU/VALU work and tap VMEM).  No im2col: 9
        # accumulating (Cout, Cin) @ (Cin, N) MXU matmuls with f32 accumulation.
        h_md = v.astype(md)
        # Center tap (dh=dw=0) never crosses the image border -> no mask.
        acc = jnp.dot(w_ref[4], h_md, preferred_element_type=jnp.float32)
        for k, s in enumerate(shifts):
            if k == 4:
                continue
            tap = lane_shift(h_md, s) * mask_ref[k]      # exact 0/1 boundary mask
            acc = acc + jnp.dot(w_ref[k], tap, preferred_element_type=jnp.float32)
        return acc + b_ref[...]                          # (Cout, N) f32

    def instance_norm(v):
        # Two-pass variance in f32, eps = 1e-5 (nn.InstanceNorm2d defaults).
        mean = jnp.mean(v, axis=1, keepdims=True)
        d = v - mean
        var = jnp.mean(d * d, axis=1, keepdims=True)
        return d * lax.rsqrt(var + 1e-5)

    def lrelu(v):
        return jnp.where(v >= 0.0, v, 0.2 * v)

    def kernel(*refs):
        if is_first_block:
            (x_ref, n1_ref, n2_ref, s1s_ref, s1b_ref, s2s_ref, s2b_ref,
             mask_ref, cw_ref, cb_ref, nw1_ref, nw2_ref, o_ref) = refs
            c1w_ref = c1b_ref = None
        else:
            (x_ref, n1_ref, n2_ref, s1s_ref, s1b_ref, s2s_ref, s2b_ref,
             mask_ref, c1w_ref, c1b_ref, cw_ref, cb_ref,
             nw1_ref, nw2_ref, o_ref) = refs

        if is_first_block:
            h = x_ref[0].astype(jnp.float32)                   # (Cin, N)
        else:
            h = conv3x3(x_ref[0], c1w_ref, c1b_ref, mask_ref)  # (Cout, N) f32
        if apply_noise:
            h = h + nw1_ref[...] * n1_ref[0]                   # (Cout,1)*(1,N)
        h = lrelu(s1s_ref[0] * instance_norm(h) + s1b_ref[0])
        h = conv3x3(h, cw_ref, cb_ref, mask_ref)
        if apply_noise:
            h = h + nw2_ref[...] * n2_ref[0]
        h = lrelu(s2s_ref[0] * instance_norm(h) + s2b_ref[0])
        o_ref[0] = h.astype(o_ref.dtype)

    return kernel


def _derive_vmem_limit(Cin, Cout, N, io_bytes, md_bytes, is_first_block):
    # Actual per-step block bytes (Pallas double-buffers every block).
    blk = (Cin + Cout) * N * io_bytes        # activation in + out
    blk += 2 * N * 4                         # noise blocks (f32)
    blk += 9 * N * md_bytes                  # boundary masks
    blk += 8 * Cout * 4                      # style scale/bias + biases + noise weights
    w_b = 9 * Cout * Cin * md_bytes
    if not is_first_block:
        w_b += 9 * Cout * Cout * md_bytes
    blk += w_b
    need = 2 * blk
    # Live in-kernel temporaries: f32 activation + f32 accumulator + norm temps
    # + one rolled/masked tap in the matmul dtype.
    need += 4 * (4 * Cout * N) + md_bytes * 2 * max(Cin, Cout) * N
    try:
        phys = int(pltpu.get_tpu_info().vmem_capacity_bytes)
    except Exception:
        phys = 64 * 1024 * 1024              # conservative (v7x) fallback
    cap = (phys * 3) // 4                    # leave headroom (2 TCs on v7x)
    return int(min(cap, max(32 * 1024 * 1024, (need * 3) // 2)))


def synthesis_block_pallas(x, w1, w2, noise1, noise2, params, *,
                           apply_noise=True, is_first_block=False,
                           matmul_dtype=jnp.bfloat16, act_io_dtype=None):
    if w2 is None:
        w2 = w1
    io_dt = jnp.dtype(act_io_dtype) if act_io_dtype is not None else jnp.dtype(x.dtype)
    if io_dt not in (jnp.dtype(jnp.float32), jnp.dtype(jnp.bfloat16)):
        io_dt = jnp.dtype(jnp.float32)
    if not is_first_block:
        # TODO(synk): fuse the 2x upsample into the kernel (4-phase conv1 taps).
        x = upsample_2x_bilinear(x.astype(jnp.float32))
    B, Cin, H, W = x.shape
    N = H * W
    Cout = (params["conv_w"] if is_first_block else params["conv2_w"]).shape[0]
    if is_first_block:
        assert Cin == Cout, "first SynthesisBlock requires in_channel == out_channel"

    hp = lax.Precision.HIGHEST
    md_bytes = jnp.dtype(matmul_dtype).itemsize
    io_bytes = io_dt.itemsize

    def tap_stack(w):
        # (O, I, 3, 3) -> (9, O, I); leading tap index k = kh*3 + kw matches the
        # kernel's shift ordering, so w_ref[k] is one clean (O, I) MXU slab.
        O, I = w.shape[0], w.shape[1]
        return jnp.transpose(w, (2, 3, 0, 1)).reshape(9, O, I).astype(matmul_dtype)

    col = lambda v: v.reshape(-1, 1).astype(jnp.float32)

    # AdaIN style affine precomputed per batch element (no in-kernel (C, w_dim)
    # reductions, no (B, w_dim) VMEM residency).
    def style(wv, sw, sb):
        out = jnp.einsum("bd,cd->bc", wv.astype(jnp.float32),
                         sw.astype(jnp.float32), precision=hp)
        return (out + sb.astype(jnp.float32)).reshape(B, Cout, 1)

    s1_scale = style(w1, params["ss_w"], params["ss_b"])
    s1_bias = style(w1, params["sb_w"], params["sb_b"])
    s2_scale = style(w2, params["ss_w"], params["ss_b"])
    s2_bias = style(w2, params["sb_w"], params["sb_b"])

    # 9 precomputed 0/1 boundary masks (image border + flat-roll wraparound),
    # shipped in the matmul dtype (exact 0/1 values; halves mask bytes for bf16).
    pos = jnp.arange(N, dtype=jnp.int32)
    row, colm = pos // W, pos % W
    masks = jnp.stack([
        (((row + dh) >= 0) & ((row + dh) < H) &
         ((colm + dw) >= 0) & ((colm + dw) < W))
        for dh in (-1, 0, 1) for dw in (-1, 0, 1)
    ]).astype(matmul_dtype).reshape(9, 1, N)

    if noise1 is None:
        noise1 = jnp.zeros((B, 1, H, W), jnp.float32)
    if noise2 is None:
        noise2 = jnp.zeros((B, 1, H, W), jnp.float32)

    x_flat = x.reshape(B, Cin, N).astype(io_dt)
    n1 = noise1.astype(jnp.float32).reshape(B, 1, N)
    n2 = noise2.astype(jnp.float32).reshape(B, 1, N)

    per_b3 = lambda b: (b, 0, 0)
    const3 = lambda b: (0, 0, 0)
    const2 = lambda b: (0, 0)

    if is_first_block:
        conv_in = [tap_stack(params["conv_w"]), col(params["conv_b"])]
        conv_specs = [pl.BlockSpec((9, Cout, Cin), const3),
                      pl.BlockSpec((Cout, 1), const2)]
        flops = 2 * 9 * Cin * Cout * N * B
    else:
        conv_in = [tap_stack(params["conv1_w"]), col(params["conv1_b"]),
                   tap_stack(params["conv2_w"]), col(params["conv2_b"])]
        conv_specs = [pl.BlockSpec((9, Cout, Cin), const3),
                      pl.BlockSpec((Cout, 1), const2),
                      pl.BlockSpec((9, Cout, Cout), const3),
                      pl.BlockSpec((Cout, 1), const2)]
        flops = 2 * 9 * (Cin + Cout) * Cout * N * B

    inputs = ([x_flat, n1, n2, s1_scale, s1_bias, s2_scale, s2_bias, masks]
              + conv_in
              + [col(params["noise1_w"]), col(params["noise2_w"])])

    in_specs = ([pl.BlockSpec((1, Cin, N), per_b3),
                 pl.BlockSpec((1, 1, N), per_b3),
                 pl.BlockSpec((1, 1, N), per_b3),
                 pl.BlockSpec((1, Cout, 1), per_b3),
                 pl.BlockSpec((1, Cout, 1), per_b3),
                 pl.BlockSpec((1, Cout, 1), per_b3),
                 pl.BlockSpec((1, Cout, 1), per_b3),
                 pl.BlockSpec((9, 1, N), const3)]
                + conv_specs
                + [pl.BlockSpec((Cout, 1), const2),
                   pl.BlockSpec((Cout, 1), const2)])

    bytes_accessed = io_bytes * (B * Cin * N + B * Cout * N) + 4 * 2 * B * N
    bytes_accessed += sum(int(a.size) * a.dtype.itemsize for a in inputs[3:])
    cost = pl.CostEstimate(flops=int(flops),
                           transcendentals=int(2 * B * Cout),
                           bytes_accessed=int(bytes_accessed))

    kernel = _make_synthesis_kernel(H, W, is_first_block, apply_noise,
                                    matmul_dtype, _roll_matches_jnp_semantics())
    out = pl.pallas_call(
        kernel,
        out_shape=jax.ShapeDtypeStruct((B, Cout, N), io_dt),
        grid=(B,),
        in_specs=in_specs,
        out_specs=pl.BlockSpec((1, Cout, N), per_b3),
        compiler_params=pltpu.CompilerParams(
            dimension_semantics=("parallel",),
            vmem_limit_bytes=_derive_vmem_limit(Cin, Cout, N, io_bytes,
                                                md_bytes, is_first_block)),
        cost_estimate=cost,
    )(*inputs)
    return out.reshape(B, Cout, H, W)


# -----------------------------------------------------------------------------
# Pure-JAX reference (mirrors the PyTorch module) for self-checking.
# conv_operand_dtype models the kernel's bf16-operand / f32-accumulate path.
# -----------------------------------------------------------------------------
def synthesis_block_ref(x, w1, w2, noise1, noise2, p, *, apply_noise,
                        is_first_block, conv_operand_dtype=jnp.float32):
    if w2 is None:
        w2 = w1
    cast = lambda v: v.astype(conv_operand_dtype).astype(jnp.float32)

    def conv(v, w, bvec):
        y = lax.conv_general_dilated(cast(v), cast(w), (1, 1), ((1, 1), (1, 1)),
                                     dimension_numbers=("NCHW", "OIHW", "NCHW"),
                                     precision=lax.Precision.HIGHEST)
        return y + bvec[None, :, None, None]

    def adain(v, wv):
        mean = v.mean(axis=(2, 3), keepdims=True)
        var = ((v - mean) ** 2).mean(axis=(2, 3), keepdims=True)
        vhat = (v - mean) / jnp.sqrt(var + 1e-5)
        scale = jnp.einsum("bd,cd->bc", wv, p["ss_w"], precision=lax.Precision.HIGHEST) + p["ss_b"]
        bias = jnp.einsum("bd,cd->bc", wv, p["sb_w"], precision=lax.Precision.HIGHEST) + p["sb_b"]
        return scale[:, :, None, None] * vhat + bias[:, :, None, None]

    act = lambda v: jnp.where(v >= 0, v, 0.2 * v)

    if not is_first_block:
        x = upsample_2x_bilinear(x)
        x = conv(x, p["conv1_w"], p["conv1_b"])
    if apply_noise:
        x = x + p["noise1_w"][None, :, None, None] * noise1
    x = act(adain(x, w1))
    x = conv(x, p["conv2_w"], p["conv2_b"]) if not is_first_block else conv(x, p["conv_w"], p["conv_b"])
    if apply_noise:
        x = x + p["noise2_w"][None, :, None, None] * noise2
    x = act(adain(x, w2))
    return x


def _max_rel_err(a, b):
    a = jnp.asarray(a, jnp.float32)
    b = jnp.asarray(b, jnp.float32)
    return float(jnp.max(jnp.abs(a - b) / (jnp.abs(b) + 1.0)))


# -----------------------------------------------------------------------------
if __name__ == "__main__":
    B, Cin, Cout, W_DIM, SIZE = 2, 8, 16, 16, 16
    key = jax.random.PRNGKey(0)
    ks = list(jax.random.split(key, 20))

    # Non-first block: input spatial = size // 2 (upsampled 2x inside the block).
    x = jax.random.normal(ks[0], (B, Cin, SIZE // 2, SIZE // 2), jnp.float32)
    w1 = jax.random.normal(ks[1], (B, W_DIM), jnp.float32)
    w2 = jax.random.normal(ks[2], (B, W_DIM), jnp.float32)
    # NoiseLayer draws randn(B, 1, size, size) at forward time; drawn here deterministically.
    noise1 = jax.random.normal(ks[3], (B, 1, SIZE, SIZE), jnp.float32)
    noise2 = jax.random.normal(ks[4], (B, 1, SIZE, SIZE), jnp.float32)

    # Deterministic synthetic parameter init (WSConv2d / WSLinear scales folded
    # into the weights; equivalent to scaling the inputs inside the module).
    sc_in = (2.0 / (Cin * 9)) ** 0.5
    sc_out = (2.0 / (Cout * 9)) ** 0.5
    sc_lin = (2.0 / W_DIM) ** 0.5
    params = {
        "conv1_w": jax.random.normal(ks[5], (Cout, Cin, 3, 3), jnp.float32) * sc_in,
        "conv1_b": 0.1 * jax.random.normal(ks[6], (Cout,), jnp.float32),
        "conv2_w": jax.random.normal(ks[7], (Cout, Cout, 3, 3), jnp.float32) * sc_out,
        "conv2_b": 0.1 * jax.random.normal(ks[8], (Cout,), jnp.float32),
        "noise1_w": 0.1 * jax.random.normal(ks[9], (Cout,), jnp.float32),
        "noise2_w": 0.1 * jax.random.normal(ks[10], (Cout,), jnp.float32),
        "ss_w": jax.random.normal(ks[11], (Cout, W_DIM), jnp.float32) * sc_lin,
        "ss_b": jnp.ones((Cout,), jnp.float32),
        "sb_w": jax.random.normal(ks[12], (Cout, W_DIM), jnp.float32) * sc_lin,
        "sb_b": jnp.zeros((Cout,), jnp.float32),
    }

    # --- Non-first block, bf16 MXU operands (default perf path). ---------------
    out_bf = synthesis_block_pallas(x, w1, w2, noise1, noise2, params,
                                    apply_noise=True, is_first_block=False)
    out_bf = jax.block_until_ready(out_bf)
    ref_bf = synthesis_block_ref(x, w1, w2, noise1, noise2, params,
                                 apply_noise=True, is_first_block=False,
                                 conv_operand_dtype=jnp.bfloat16)
    assert out_bf.shape == (B, Cout, SIZE, SIZE), out_bf.shape
    err_bf = _max_rel_err(out_bf, ref_bf)
    assert err_bf < 2e-2, f"non-first-block (bf16 operands) mismatch: {err_bf}"

    # --- Non-first block, f32 operand path (tight structural check). -----------
    out_f32 = synthesis_block_pallas(x, w1, w2, noise1, noise2, params,
                                     apply_noise=True, is_first_block=False,
                                     matmul_dtype=jnp.float32)
    out_f32 = jax.block_until_ready(out_f32)
    ref_f32 = synthesis_block_ref(x, w1, w2, noise1, noise2, params,
                                  apply_noise=True, is_first_block=False,
                                  conv_operand_dtype=jnp.float32)
    err_f32 = _max_rel_err(out_f32, ref_f32)
    assert err_f32 < 1e-2, f"non-first-block (f32 operands) mismatch: {err_f32}"

    # --- Non-first block, bf16 activation I/O (memory-bound high-res path). ----
    out_b16io = synthesis_block_pallas(x, w1, w2, noise1, noise2, params,
                                       apply_noise=True, is_first_block=False,
                                       act_io_dtype=jnp.bfloat16)
    out_b16io = jax.block_until_ready(out_b16io)
    assert out_b16io.dtype == jnp.bfloat16, out_b16io.dtype
    assert bool(jnp.all(jnp.isfinite(out_b16io.astype(jnp.float32))))
    err_io = _max_rel_err(out_b16io, out_bf)
    assert err_io < 1e-1, f"bf16-I/O path diverged from f32-I/O path: {err_io}"

    # --- First-block configuration (in_channel == out_channel, no conv1, w2=None).
    params_first = {
        "conv_w": params["conv2_w"], "conv_b": params["conv2_b"],
        "noise1_w": params["noise1_w"], "noise2_w": params["noise2_w"],
        "ss_w": params["ss_w"], "ss_b": params["ss_b"],
        "sb_w": params["sb_w"], "sb_b": params["sb_b"],
    }
    xf = jax.random.normal(ks[13], (B, Cout, SIZE, SIZE), jnp.float32)
    outf = synthesis_block_pallas(xf, w1, None, noise1, noise2, params_first,
                                  apply_noise=True, is_first_block=True)
    outf = jax.block_until_ready(outf)
    reff = synthesis_block_ref(xf, w1, None, noise1, noise2, params_first,
                               apply_noise=True, is_first_block=True,
                               conv_operand_dtype=jnp.bfloat16)
    errf = _max_rel_err(outf, reff)
    assert errf < 2e-2, f"first-block mismatch: {errf}"

    print("KERNEL_OK")
</pallas_src>

<mosaic_0001>
module attributes {stable_mosaic.version = 11 : i64} {
  func.func @probe(%arg0: memref<8x128xf32, #tpu.memory_space<vmem>>, %arg1: memref<8x128xf32, #tpu.memory_space<vmem>>) attributes {dimension_semantics = [], scalar_prefetch = 0 : i64, scratch_operands = 0 : i64, tpu.core_type = #tpu.core_type<tc>} {
    %c0 = arith.constant 0 : index
    %c0_0 = arith.constant 0 : index
    %0 = vector.load %arg0[%c0, %c0_0] : memref<8x128xf32, #tpu.memory_space<vmem>>, vector<8x128xf32>
    %c1_i32 = arith.constant 1 : i32
    %1 = tpu.dynamic_rotate %0 by %c1_i32 dim 1 : vector<8x128xf32>, i32 -> vector<8x128xf32>
    %c0_1 = arith.constant 0 : index
    %c0_2 = arith.constant 0 : index
    %2 = vector.load %arg1[%c0_1, %c0_2] : memref<8x128xf32, #tpu.memory_space<vmem>>, vector<8x128xf32>
    tpu.vector_store %arg1[%c0_1, %c0_2], %1 {strides = array<i32>} : memref<8x128xf32, #tpu.memory_space<vmem>>, vector<8x128xf32>,
    return
  }
}

</mosaic_0001>

<bundles_post_ra>
// kernel: tpu_custom_call.1
= control target key start
LH: loop header
LB: loop body
LE: loop exit
PB: predicated region body
PF: predicated region fallthrough
CT: control target
= control target key end

     0   :  { %6 = vsyncpa [#allocation3], 0  ;;  %s128_s0 = inlined_call_operand.hbm [shape: f32[8,128], index: 0, kind: input, shape index: {}]   ;;  %s129_s1 = inlined_call_operand.hbm [shape: f32[8,128], index: 1, kind: output, shape index: {}]  }
   0x1   :  { %7 = vsyncpa [#allocation4], 0  ;;  %s91_s6 = smov [#allocation2]   ;;  %s43_s10 = scalar_lea.hbm %s128_s0, 128 }
   0x2   :  { %s14_s7 = sshll.u32 %s91_s6, 4  ;;  %p44_p0 = scmp.ne.s32.totalorder %s128_s0, %s43_s10  ;;  %s15_s7 = int_to_ptr.vmem [resolvable:$true] %s14_s7 }
   0x3   :  { %p47_p1 = scmp.lt.u32.totalorder %s43_s10, %s128_s0 }
   0x5   :  { %p49_p2 = pnand %p47_p1, %p44_p0 }
   0x7   :  { %52 = shalt.err (!%p49_p2)
}
   0x8   :  { %s53_s15 = scalar_lea.vmem %s15_s7, 128  ;;  %p58_p4 = scmp.lt.s32.totalorder %s15_s7, %s15_s7 }
   0x9   :  { %p54_p3 = scmp.ne.s32.totalorder %s15_s7, %s53_s15  ;;  %p59_p5 = scmp.lt.s32.totalorder %s53_s15, %s53_s15 }
   0xb   :  { %p60_p6 = por %p59_p5, %p58_p4 }
   0xd   :  { %p61_p7 = pnand %p60_p6, %p54_p3 }
   0xf   :  { %64 = shalt.err (!%p61_p7)
}
  0x10   :  { %17 = dma.hbm_to_vmem [thread:$0]  %s128_s0, 128, %s15_s7, [#allocation3]  }
  0x11   :  { %87 = dma.done.wait [#allocation3], 128  }
  0x12   :  { %88 = vsyncadd [#allocation3], 4294967168  ;;  %v21_v0 = vld [vmem:[#allocation2] sm:$0xff]  ;;  %s92_s18 = smov 1   ;;  %s93_s19 = smov [#allocation5]  }
  0x13   :  { %22 = vrot.lane.b32.xlu0 %v21_v0, %s92_s18  ;;  %s31_s20 = sshll.u32 %s93_s19, 4  ;;  %s32_s20 = int_to_ptr.vmem [resolvable:$true] %s31_s20 }
  0x14   :  { %s65_s21 = scalar_lea.vmem %s32_s20, 128  ;;  %p70_p9 = scmp.lt.s32.totalorder %s32_s20, %s32_s20 }
  0x15   :  { %p66_p8 = scmp.ne.s32.totalorder %s32_s20, %s65_s21  ;;  %p71_p10 = scmp.lt.s32.totalorder %s65_s21, %s65_s21 }
  0x17   :  { %p72_p11 = por %p71_p10, %p70_p9 }
  0x19   :  { %p73_p12 = pnand %p72_p11, %p66_p8 }
  0x85   :  { %v23_v1 = vpop.permute.xlu0 %22 }
  0x86   :  { %24 = vst [vmem:[#allocation5] sm:$0xff] %v23_v1 }
  0x87   :  { %76 = shalt.err (!%p73_p12)
}
  0x88   :  { %s77_s0 = scalar_lea.hbm %s129_s1, 128 }
  0x89   :  { %p78_p13 = scmp.ne.s32.totalorder %s129_s1, %s77_s0  ;;  %p81_p0 = scmp.lt.u32.totalorder %s77_s0, %s129_s1 }
  0x8b   :  { %p83_p1 = pnand %p81_p0, %p78_p13 }
  0x8d   :  { %86 = shalt.err (!%p83_p1)
}
  0x8e   :  { %34 = dma.vmem_to_hbm [thread:$0]  %s32_s20, 128, %s129_s1, [#allocation4]  }
  0x8f   :  { %89 = dma.done.wait [#allocation4], 128  }
  0x90   :  { %90 = vsyncadd [#allocation4], 4294967168 }
  0x91   :  { %38 = vsyncpa [#allocation3], 1 }
  0x92   :  { %39 = vsyncpa [#allocation4], 1 }

</bundles_post_ra>
